<compile_context>
chip_gen: v7x
topology: tpu7x:2x2x1
jax: 0.10.0
libtpu: 0.0.40
codegen_flags: <defaults>
</compile_context>

<pallas_src>
import math

import jax
import jax.numpy as jnp
from jax.experimental import pallas as pl
from jax.experimental.pallas import tpu as pltpu

K_PAD = 128  # lane-dense padded tag dimension


# ----------------------------- Pallas kernel --------------------------------
def bilstm_kernel(
    x_ref,      # (T*B, 2E)   [x(t) | x(T-1-t)] rows, flattened time-major (row = t*B + b)
    wih_ref,    # (2E, 8H)    block-diag fused W_ih^T, gate-permuted, sigmoid cols * 0.5
    bih_ref,    # (1, 8H)     fused bias (b_ih + b_hh per dir), gate-permuted, sig cols * 0.5
    whh_ref,    # (2H, 8H)    block-diag fused W_hh^T, gate-permuted, sigmoid cols * 0.5
    h0_ref,     # (B, 2H)     [h0_f | h0_b]
    c0_ref,     # (B, 2H)     [c0_f | c0_b]
    wlin_ref,   # (2H, K_PAD) linear weight^T, lanes zero-padded
    blin_ref,   # (1, K_PAD)  linear bias, lanes zero-padded
    out_ref,    # (T*B, K_PAD) emission scores, flattened time-major
):
    TB = x_ref.shape[0]
    B, H2 = h0_ref.shape          # H2 = 2H (both directions fused)
    H = H2 // 2
    T = TB // B
    S = 6 * H                     # sigmoid-gate lanes: [i_f,i_b,f_f,f_b,o_f,o_b]

    # Hoisted input projection: all timesteps & both directions in one lane-dense matmul.
    # gx row block i = [fwd gates(t=i) | bwd gates(t=T-1-i)], gate-permuted & 0.5-prescaled.
    gx = jnp.dot(x_ref[...], wih_ref[...], preferred_element_type=jnp.float32) + bih_ref[...]

    whh = whh_ref[...]
    h = h0_ref[...]               # (B, 2H) = [h_f | h_b]
    c = c0_ref[...]

    # Fully unrolled fused recurrence (T is small & static). One MXU push + two tanh
    # EUP pushes + a handful of 32-lane VPU ops per step.
    h_steps = []
    for i in range(T):
        gates = gx[i * B:(i + 1) * B, :] + jnp.dot(
            h, whh, preferred_element_type=jnp.float32)          # (B, 8H)
        t_all = jnp.tanh(gates)                                   # single EUP push, 128 lanes
        s = 0.5 * t_all[:, :S] + 0.5                               # sigmoid(orig pre-act)
        i_cat = s[:, 0:H2]                                         # [i_f | i_b]
        f_cat = s[:, H2:2 * H2]                                    # [f_f | f_b]
        o_cat = s[:, 2 * H2:3 * H2]                                # [o_f | o_b]
        g_cat = t_all[:, S:]                                       # [g_f | g_b]
        c = f_cat * c + i_cat * g_cat
        h = o_cat * jnp.tanh(c)                                    # second EUP push
        h_steps.append(h)                                          # stays in vregs

    # Re-pair directions for the output: row block t needs [h_f(t) | h_b(t)].
    # Step i produced [h_f(i) | h_b(T-1-i)]; pick fwd lanes from step t and bwd lanes
    # from step T-1-t with a hoisted lane mask (pure VPU select, no XLU, no scratch).
    lane_is_fwd = jax.lax.broadcasted_iota(jnp.int32, (B, H2), 1) < H
    slab = jnp.concatenate(
        [jnp.where(lane_is_fwd, h_steps[t], h_steps[T - 1 - t]) for t in range(T)],
        axis=0)                                                    # (T*B, 2H)

    # Single epilogue matmul, lane-dense unmasked output stores.
    emis = jnp.dot(slab, wlin_ref[...], preferred_element_type=jnp.float32) + blin_ref[...]
    out_ref[...] = emis.astype(out_ref.dtype)


# ------------------------- wrapper-side weight fusion -------------------------
def _fuse_direction_weights(wih_f_T, whh_f_T, b_f, wih_b_T, whh_b_T, b_b):
    """Block-diagonal fused weights with gate columns reordered to
    [i_f, i_b, f_f, f_b, o_f, o_b, g_f, g_b] and sigmoid-gate columns pre-scaled by 0.5
    (so a single in-kernel tanh yields sigmoid via 0.5*tanh(0.5*x)+0.5)."""
    E, fourH = wih_f_T.shape
    H = fourH // 4

    wih = jnp.zeros((2 * E, 8 * H), jnp.float32)
    wih = wih.at[:E, :4 * H].set(wih_f_T).at[E:, 4 * H:].set(wih_b_T)
    whh = jnp.zeros((2 * H, 8 * H), jnp.float32)
    whh = whh.at[:H, :4 * H].set(whh_f_T).at[H:, 4 * H:].set(whh_b_T)
    b = jnp.concatenate([b_f, b_b], axis=1)                        # (1, 8H)

    # Source (PyTorch) block order: [i_f, f_f, g_f, o_f, i_b, f_b, g_b, o_b]
    # Destination block order:      [i_f, i_b, f_f, f_b, o_f, o_b, g_f, g_b]
    blocks = [0, 4, 1, 5, 3, 7, 2, 6]
    perm = jnp.concatenate([jnp.arange(bk * H, (bk + 1) * H) for bk in blocks])
    wih, whh, b = wih[:, perm], whh[:, perm], b[:, perm]

    scale = jnp.concatenate(
        [jnp.full((6 * H,), 0.5, jnp.float32), jnp.ones((2 * H,), jnp.float32)])[None, :]
    return wih * scale, whh * scale, b * scale


# ------------------------------- wrapper -------------------------------------
def bilstm_forward(sentence_ids, params, h0, c0):
    """sentence_ids: (B, T) int32.  Returns (B, T, tag_size) float32."""
    emb = params["embedding"]                    # (V, E)
    B, T = sentence_ids.shape
    E = params["wih_f_T"].shape[0]
    H = params["whh_f_T"].shape[0]
    K = params["blin"].shape[1]

    # Embedding gather directly into flattened time-major layout (row = t*B + b),
    # duplicated as [x(t) | x(T-1-t)] so the bwd direction needs no per-step lane slice.
    ids_tm = jnp.transpose(sentence_ids).reshape(-1)                  # (T*B,)
    x_tm = jnp.take(emb, ids_tm, axis=0).reshape(T, B, E)             # (T, B, E)
    x_cat = jnp.concatenate([x_tm, x_tm[::-1]], axis=-1).reshape(T * B, 2 * E)

    wih, whh, bih = _fuse_direction_weights(
        params["wih_f_T"], params["whh_f_T"], params["b_f"],
        params["wih_b_T"], params["whh_b_T"], params["b_b"])

    wlin_T = params["wlin_T"]                                         # (2H, K)
    wlin = jnp.zeros((2 * H, K_PAD), jnp.float32).at[:, :K].set(wlin_T)
    blin = jnp.zeros((1, K_PAD), jnp.float32).at[:, :K].set(params["blin"])

    h0_cat = jnp.concatenate([h0[0], h0[1]], axis=1)                  # (B, 2H)
    c0_cat = jnp.concatenate([c0[0], c0[1]], axis=1)                  # (B, 2H)

    out_flat = pl.pallas_call(
        bilstm_kernel,
        out_shape=jax.ShapeDtypeStruct((T * B, K_PAD), jnp.float32),
        in_specs=[pl.BlockSpec(memory_space=pltpu.MemorySpace.VMEM)] * 8,
        out_specs=pl.BlockSpec(memory_space=pltpu.MemorySpace.VMEM),
    )(x_cat, wih, bih, whh, h0_cat, c0_cat, wlin, blin)

    out = out_flat[:, :K].reshape(T, B, K)
    return jnp.transpose(out, (1, 0, 2))         # (B, T, K)


# --------------------------- pure-JAX reference -------------------------------
def bilstm_reference(sentence_ids, params, h0, c0):
    emb = params["embedding"]
    x = jnp.take(emb, sentence_ids, axis=0)       # (B, T, E)
    x = jnp.transpose(x, (1, 0, 2))               # (T, B, E)
    H = params["whh_f_T"].shape[0]

    def run_dir(xs, h0_, c0_, wih, whh, b):
        def step(carry, x_t):
            h, c = carry
            gates = x_t @ wih + h @ whh + b
            i_g = jax.nn.sigmoid(gates[:, 0:H])
            f_g = jax.nn.sigmoid(gates[:, H:2 * H])
            g_g = jnp.tanh(gates[:, 2 * H:3 * H])
            o_g = jax.nn.sigmoid(gates[:, 3 * H:4 * H])
            c = f_g * c + i_g * g_g
            h = o_g * jnp.tanh(c)
            return (h, c), h
        _, hs = jax.lax.scan(step, (h0_, c0_), xs)
        return hs

    hf = run_dir(x, h0[0], c0[0], params["wih_f_T"], params["whh_f_T"], params["b_f"])
    hb = run_dir(x[::-1], h0[1], c0[1], params["wih_b_T"], params["whh_b_T"], params["b_b"])[::-1]
    hcat = jnp.concatenate([hf, hb], axis=-1)     # (T, B, 2H)
    emis = hcat @ params["wlin_T"] + params["blin"]
    return jnp.transpose(emis, (1, 0, 2))


# ------------------------------ param setup -----------------------------------
def init_params(key, vocab_size, embed_size, hidden_size, tag_size):
    H = hidden_size // 2
    k_lstm = 1.0 / math.sqrt(H)
    k_lin = 1.0 / math.sqrt(hidden_size)
    keys = jax.random.split(key, 12)

    def u(k_, shape, bound):
        return jax.random.uniform(k_, shape, jnp.float32, -bound, bound)

    emb = jax.random.normal(keys[0], (vocab_size, embed_size), jnp.float32)

    wih_f = u(keys[1], (4 * H, embed_size), k_lstm)
    whh_f = u(keys[2], (4 * H, H), k_lstm)
    bih_f = u(keys[3], (4 * H,), k_lstm)
    bhh_f = u(keys[4], (4 * H,), k_lstm)

    wih_b = u(keys[5], (4 * H, embed_size), k_lstm)
    whh_b = u(keys[6], (4 * H, H), k_lstm)
    bih_b = u(keys[7], (4 * H,), k_lstm)
    bhh_b = u(keys[8], (4 * H,), k_lstm)

    wlin = u(keys[9], (tag_size, hidden_size), k_lin)
    blin = u(keys[10], (tag_size,), k_lin)

    return {
        "embedding": emb,
        "wih_f_T": wih_f.T, "whh_f_T": whh_f.T, "b_f": (bih_f + bhh_f)[None, :],
        "wih_b_T": wih_b.T, "whh_b_T": whh_b.T, "b_b": (bih_b + bhh_b)[None, :],
        "wlin_T": wlin.T, "blin": blin[None, :],
    }


# --------------------------------- main ---------------------------------------
if __name__ == "__main__":
    tag_to_id = {"O": 0, "B-dis": 1, "I-dis": 2, "B-sym": 3, "I-sym": 4}
    vocab_size = 50
    input_feature_size = 16          # embedding_size (LSTM input size)
    hidden_size = 32                 # per-direction hidden = 16
    batch_size = 2                   # NOTE: B >= 8 would fill sublanes; kept at module default
    sentence_length = 8
    tag_size = len(tag_to_id)
    H = hidden_size // 2

    key = jax.random.PRNGKey(0)
    k_params, k_ids, k_h0, k_c0 = jax.random.split(key, 4)

    params = init_params(k_params, vocab_size, input_feature_size, hidden_size, tag_size)
    sentence_ids = jax.random.randint(
        k_ids, (batch_size, sentence_length), 0, vocab_size, dtype=jnp.int32
    )
    # Module draws random h0/c0 every forward (torch.randn); here drawn deterministically.
    h0 = jax.random.normal(k_h0, (2, batch_size, H), jnp.float32)
    c0 = jax.random.normal(k_c0, (2, batch_size, H), jnp.float32)

    out = bilstm_forward(sentence_ids, params, h0, c0)
    out = jax.block_until_ready(out)

    ref = jax.block_until_ready(bilstm_reference(sentence_ids, params, h0, c0))
    assert out.shape == (batch_size, sentence_length, tag_size), out.shape
    assert jnp.allclose(out, ref, atol=2e-4, rtol=2e-4), float(jnp.abs(out - ref).max())

    print("KERNEL_OK")
</pallas_src>

<mosaic_0001>
module attributes {stable_mosaic.version = 11 : i64} {
  func.func @bilstm_kernel(%arg0: memref<16x32xf32, #tpu.memory_space<vmem>>, %arg1: memref<32x128xf32, #tpu.memory_space<vmem>>, %arg2: memref<1x128xf32, #tpu.memory_space<vmem>>, %arg3: memref<32x128xf32, #tpu.memory_space<vmem>>, %arg4: memref<2x32xf32, #tpu.memory_space<vmem>>, %arg5: memref<2x32xf32, #tpu.memory_space<vmem>>, %arg6: memref<32x128xf32, #tpu.memory_space<vmem>>, %arg7: memref<1x128xf32, #tpu.memory_space<vmem>>, %arg8: memref<16x128xf32, #tpu.memory_space<vmem>>) attributes {dimension_semantics = [], scalar_prefetch = 0 : i64, scratch_operands = 0 : i64, tpu.core_type = #tpu.core_type<tc>} {
    %c0 = arith.constant 0 : index
    %c0_0 = arith.constant 0 : index
    %0 = vector.load %arg0[%c0, %c0_0] : memref<16x32xf32, #tpu.memory_space<vmem>>, vector<16x32xf32>
    %c0_1 = arith.constant 0 : index
    %c0_2 = arith.constant 0 : index
    %1 = vector.load %arg1[%c0_1, %c0_2] : memref<32x128xf32, #tpu.memory_space<vmem>>, vector<32x128xf32>
    %cst = arith.constant dense<0.000000e+00> : vector<16x128xf32>
    %2 = tpu.matmul %0, %1, %cst {dimension_numbers = #tpu.dot_dimension_numbers<[1], [0], [0], [1], [0, 0, 1, 1], [], []>} : vector<16x32xf32>, vector<32x128xf32>, vector<16x128xf32> -> vector<16x128xf32>
    %c0_3 = arith.constant 0 : index
    %c0_4 = arith.constant 0 : index
    %3 = vector.load %arg2[%c0_3, %c0_4] : memref<1x128xf32, #tpu.memory_space<vmem>>, vector<1x128xf32>
    %4 = vector.broadcast %3 : vector<1x128xf32> to vector<16x128xf32>
    %5 = arith.addf %2, %4 : vector<16x128xf32>
    %c0_5 = arith.constant 0 : index
    %c0_6 = arith.constant 0 : index
    %6 = vector.load %arg3[%c0_5, %c0_6] : memref<32x128xf32, #tpu.memory_space<vmem>>, vector<32x128xf32>
    %c0_7 = arith.constant 0 : index
    %c0_8 = arith.constant 0 : index
    %7 = vector.load %arg4[%c0_7, %c0_8] : memref<2x32xf32, #tpu.memory_space<vmem>>, vector<2x32xf32>
    %c0_9 = arith.constant 0 : index
    %c0_10 = arith.constant 0 : index
    %8 = vector.load %arg5[%c0_9, %c0_10] : memref<2x32xf32, #tpu.memory_space<vmem>>, vector<2x32xf32>
    %9 = vector.extract_strided_slice %5 {offsets = [0, 0], sizes = [2, 128], strides = [1, 1]} : vector<16x128xf32> to vector<2x128xf32>
    %cst_11 = arith.constant dense<0.000000e+00> : vector<2x128xf32>
    %10 = tpu.matmul %7, %6, %cst_11 {dimension_numbers = #tpu.dot_dimension_numbers<[1], [0], [0], [1], [0, 0, 1, 1], [], []>} : vector<2x32xf32>, vector<32x128xf32>, vector<2x128xf32> -> vector<2x128xf32>
    %11 = arith.addf %9, %10 : vector<2x128xf32>
    %12 = math.tanh %11 : vector<2x128xf32>
    %13 = vector.extract_strided_slice %12 {offsets = [0, 0], sizes = [2, 96], strides = [1, 1]} : vector<2x128xf32> to vector<2x96xf32>
    %cst_12 = arith.constant 5.000000e-01 : f32
    %14 = vector.broadcast %cst_12 : f32 to vector<2x96xf32>
    %15 = arith.mulf %14, %13 : vector<2x96xf32>
    %cst_13 = arith.constant 5.000000e-01 : f32
    %16 = vector.broadcast %cst_13 : f32 to vector<2x96xf32>
    %17 = arith.addf %15, %16 : vector<2x96xf32>
    %18 = vector.extract_strided_slice %17 {offsets = [0, 0], sizes = [2, 32], strides = [1, 1]} : vector<2x96xf32> to vector<2x32xf32>
    %19 = vector.extract_strided_slice %17 {offsets = [0, 32], sizes = [2, 32], strides = [1, 1]} : vector<2x96xf32> to vector<2x32xf32>
    %20 = vector.extract_strided_slice %17 {offsets = [0, 64], sizes = [2, 32], strides = [1, 1]} : vector<2x96xf32> to vector<2x32xf32>
    %21 = vector.extract_strided_slice %12 {offsets = [0, 96], sizes = [2, 32], strides = [1, 1]} : vector<2x128xf32> to vector<2x32xf32>
    %22 = arith.mulf %19, %8 : vector<2x32xf32>
    %23 = arith.mulf %18, %21 : vector<2x32xf32>
    %24 = arith.addf %22, %23 : vector<2x32xf32>
    %25 = math.tanh %24 : vector<2x32xf32>
    %26 = arith.mulf %20, %25 : vector<2x32xf32>
    %27 = vector.extract_strided_slice %5 {offsets = [2, 0], sizes = [2, 128], strides = [1, 1]} : vector<16x128xf32> to vector<2x128xf32>
    %cst_14 = arith.constant dense<0.000000e+00> : vector<2x128xf32>
    %28 = tpu.matmul %26, %6, %cst_14 {dimension_numbers = #tpu.dot_dimension_numbers<[1], [0], [0], [1], [0, 0, 1, 1], [], []>} : vector<2x32xf32>, vector<32x128xf32>, vector<2x128xf32> -> vector<2x128xf32>
    %29 = arith.addf %27, %28 : vector<2x128xf32>
    %30 = math.tanh %29 : vector<2x128xf32>
    %31 = vector.extract_strided_slice %30 {offsets = [0, 0], sizes = [2, 96], strides = [1, 1]} : vector<2x128xf32> to vector<2x96xf32>
    %cst_15 = arith.constant 5.000000e-01 : f32
    %32 = vector.broadcast %cst_15 : f32 to vector<2x96xf32>
    %33 = arith.mulf %32, %31 : vector<2x96xf32>
    %cst_16 = arith.constant 5.000000e-01 : f32
    %34 = vector.broadcast %cst_16 : f32 to vector<2x96xf32>
    %35 = arith.addf %33, %34 : vector<2x96xf32>
    %36 = vector.extract_strided_slice %35 {offsets = [0, 0], sizes = [2, 32], strides = [1, 1]} : vector<2x96xf32> to vector<2x32xf32>
    %37 = vector.extract_strided_slice %35 {offsets = [0, 32], sizes = [2, 32], strides = [1, 1]} : vector<2x96xf32> to vector<2x32xf32>
    %38 = vector.extract_strided_slice %35 {offsets = [0, 64], sizes = [2, 32], strides = [1, 1]} : vector<2x96xf32> to vector<2x32xf32>
    %39 = vector.extract_strided_slice %30 {offsets = [0, 96], sizes = [2, 32], strides = [1, 1]} : vector<2x128xf32> to vector<2x32xf32>
    %40 = arith.mulf %37, %24 : vector<2x32xf32>
    %41 = arith.mulf %36, %39 : vector<2x32xf32>
    %42 = arith.addf %40, %41 : vector<2x32xf32>
    %43 = math.tanh %42 : vector<2x32xf32>
    %44 = arith.mulf %38, %43 : vector<2x32xf32>
    %45 = vector.extract_strided_slice %5 {offsets = [4, 0], sizes = [2, 128], strides = [1, 1]} : vector<16x128xf32> to vector<2x128xf32>
    %cst_17 = arith.constant dense<0.000000e+00> : vector<2x128xf32>
    %46 = tpu.matmul %44, %6, %cst_17 {dimension_numbers = #tpu.dot_dimension_numbers<[1], [0], [0], [1], [0, 0, 1, 1], [], []>} : vector<2x32xf32>, vector<32x128xf32>, vector<2x128xf32> -> vector<2x128xf32>
    %47 = arith.addf %45, %46 : vector<2x128xf32>
    %48 = math.tanh %47 : vector<2x128xf32>
    %49 = vector.extract_strided_slice %48 {offsets = [0, 0], sizes = [2, 96], strides = [1, 1]} : vector<2x128xf32> to vector<2x96xf32>
    %cst_18 = arith.constant 5.000000e-01 : f32
    %50 = vector.broadcast %cst_18 : f32 to vector<2x96xf32>
    %51 = arith.mulf %50, %49 : vector<2x96xf32>
    %cst_19 = arith.constant 5.000000e-01 : f32
    %52 = vector.broadcast %cst_19 : f32 to vector<2x96xf32>
    %53 = arith.addf %51, %52 : vector<2x96xf32>
    %54 = vector.extract_strided_slice %53 {offsets = [0, 0], sizes = [2, 32], strides = [1, 1]} : vector<2x96xf32> to vector<2x32xf32>
    %55 = vector.extract_strided_slice %53 {offsets = [0, 32], sizes = [2, 32], strides = [1, 1]} : vector<2x96xf32> to vector<2x32xf32>
    %56 = vector.extract_strided_slice %53 {offsets = [0, 64], sizes = [2, 32], strides = [1, 1]} : vector<2x96xf32> to vector<2x32xf32>
    %57 = vector.extract_strided_slice %48 {offsets = [0, 96], sizes = [2, 32], strides = [1, 1]} : vector<2x128xf32> to vector<2x32xf32>
    %58 = arith.mulf %55, %42 : vector<2x32xf32>
    %59 = arith.mulf %54, %57 : vector<2x32xf32>
    %60 = arith.addf %58, %59 : vector<2x32xf32>
    %61 = math.tanh %60 : vector<2x32xf32>
    %62 = arith.mulf %56, %61 : vector<2x32xf32>
    %63 = vector.extract_strided_slice %5 {offsets = [6, 0], sizes = [2, 128], strides = [1, 1]} : vector<16x128xf32> to vector<2x128xf32>
    %cst_20 = arith.constant dense<0.000000e+00> : vector<2x128xf32>
    %64 = tpu.matmul %62, %6, %cst_20 {dimension_numbers = #tpu.dot_dimension_numbers<[1], [0], [0], [1], [0, 0, 1, 1], [], []>} : vector<2x32xf32>, vector<32x128xf32>, vector<2x128xf32> -> vector<2x128xf32>
    %65 = arith.addf %63, %64 : vector<2x128xf32>
    %66 = math.tanh %65 : vector<2x128xf32>
    %67 = vector.extract_strided_slice %66 {offsets = [0, 0], sizes = [2, 96], strides = [1, 1]} : vector<2x128xf32> to vector<2x96xf32>
    %cst_21 = arith.constant 5.000000e-01 : f32
    %68 = vector.broadcast %cst_21 : f32 to vector<2x96xf32>
    %69 = arith.mulf %68, %67 : vector<2x96xf32>
    %cst_22 = arith.constant 5.000000e-01 : f32
    %70 = vector.broadcast %cst_22 : f32 to vector<2x96xf32>
    %71 = arith.addf %69, %70 : vector<2x96xf32>
    %72 = vector.extract_strided_slice %71 {offsets = [0, 0], sizes = [2, 32], strides = [1, 1]} : vector<2x96xf32> to vector<2x32xf32>
    %73 = vector.extract_strided_slice %71 {offsets = [0, 32], sizes = [2, 32], strides = [1, 1]} : vector<2x96xf32> to vector<2x32xf32>
    %74 = vector.extract_strided_slice %71 {offsets = [0, 64], sizes = [2, 32], strides = [1, 1]} : vector<2x96xf32> to vector<2x32xf32>
    %75 = vector.extract_strided_slice %66 {offsets = [0, 96], sizes = [2, 32], strides = [1, 1]} : vector<2x128xf32> to vector<2x32xf32>
    %76 = arith.mulf %73, %60 : vector<2x32xf32>
    %77 = arith.mulf %72, %75 : vector<2x32xf32>
    %78 = arith.addf %76, %77 : vector<2x32xf32>
    %79 = math.tanh %78 : vector<2x32xf32>
    %80 = arith.mulf %74, %79 : vector<2x32xf32>
    %81 = vector.extract_strided_slice %5 {offsets = [8, 0], sizes = [2, 128], strides = [1, 1]} : vector<16x128xf32> to vector<2x128xf32>
    %cst_23 = arith.constant dense<0.000000e+00> : vector<2x128xf32>
    %82 = tpu.matmul %80, %6, %cst_23 {dimension_numbers = #tpu.dot_dimension_numbers<[1], [0], [0], [1], [0, 0, 1, 1], [], []>} : vector<2x32xf32>, vector<32x128xf32>, vector<2x128xf32> -> vector<2x128xf32>
    %83 = arith.addf %81, %82 : vector<2x128xf32>
    %84 = math.tanh %83 : vector<2x128xf32>
    %85 = vector.extract_strided_slice %84 {offsets = [0, 0], sizes = [2, 96], strides = [1, 1]} : vector<2x128xf32> to vector<2x96xf32>
    %cst_24 = arith.constant 5.000000e-01 : f32
    %86 = vector.broadcast %cst_24 : f32 to vector<2x96xf32>
    %87 = arith.mulf %86, %85 : vector<2x96xf32>
    %cst_25 = arith.constant 5.000000e-01 : f32
    %88 = vector.broadcast %cst_25 : f32 to vector<2x96xf32>
    %89 = arith.addf %87, %88 : vector<2x96xf32>
    %90 = vector.extract_strided_slice %89 {offsets = [0, 0], sizes = [2, 32], strides = [1, 1]} : vector<2x96xf32> to vector<2x32xf32>
    %91 = vector.extract_strided_slice %89 {offsets = [0, 32], sizes = [2, 32], strides = [1, 1]} : vector<2x96xf32> to vector<2x32xf32>
    %92 = vector.extract_strided_slice %89 {offsets = [0, 64], sizes = [2, 32], strides = [1, 1]} : vector<2x96xf32> to vector<2x32xf32>
    %93 = vector.extract_strided_slice %84 {offsets = [0, 96], sizes = [2, 32], strides = [1, 1]} : vector<2x128xf32> to vector<2x32xf32>
    %94 = arith.mulf %91, %78 : vector<2x32xf32>
    %95 = arith.mulf %90, %93 : vector<2x32xf32>
    %96 = arith.addf %94, %95 : vector<2x32xf32>
    %97 = math.tanh %96 : vector<2x32xf32>
    %98 = arith.mulf %92, %97 : vector<2x32xf32>
    %99 = vector.extract_strided_slice %5 {offsets = [10, 0], sizes = [2, 128], strides = [1, 1]} : vector<16x128xf32> to vector<2x128xf32>
    %cst_26 = arith.constant dense<0.000000e+00> : vector<2x128xf32>
    %100 = tpu.matmul %98, %6, %cst_26 {dimension_numbers = #tpu.dot_dimension_numbers<[1], [0], [0], [1], [0, 0, 1, 1], [], []>} : vector<2x32xf32>, vector<32x128xf32>, vector<2x128xf32> -> vector<2x128xf32>
    %101 = arith.addf %99, %100 : vector<2x128xf32>
    %102 = math.tanh %101 : vector<2x128xf32>
    %103 = vector.extract_strided_slice %102 {offsets = [0, 0], sizes = [2, 96], strides = [1, 1]} : vector<2x128xf32> to vector<2x96xf32>
    %cst_27 = arith.constant 5.000000e-01 : f32
    %104 = vector.broadcast %cst_27 : f32 to vector<2x96xf32>
    %105 = arith.mulf %104, %103 : vector<2x96xf32>
    %cst_28 = arith.constant 5.000000e-01 : f32
    %106 = vector.broadcast %cst_28 : f32 to vector<2x96xf32>
    %107 = arith.addf %105, %106 : vector<2x96xf32>
    %108 = vector.extract_strided_slice %107 {offsets = [0, 0], sizes = [2, 32], strides = [1, 1]} : vector<2x96xf32> to vector<2x32xf32>
    %109 = vector.extract_strided_slice %107 {offsets = [0, 32], sizes = [2, 32], strides = [1, 1]} : vector<2x96xf32> to vector<2x32xf32>
    %110 = vector.extract_strided_slice %107 {offsets = [0, 64], sizes = [2, 32], strides = [1, 1]} : vector<2x96xf32> to vector<2x32xf32>
    %111 = vector.extract_strided_slice %102 {offsets = [0, 96], sizes = [2, 32], strides = [1, 1]} : vector<2x128xf32> to vector<2x32xf32>
    %112 = arith.mulf %109, %96 : vector<2x32xf32>
    %113 = arith.mulf %108, %111 : vector<2x32xf32>
    %114 = arith.addf %112, %113 : vector<2x32xf32>
    %115 = math.tanh %114 : vector<2x32xf32>
    %116 = arith.mulf %110, %115 : vector<2x32xf32>
    %117 = vector.extract_strided_slice %5 {offsets = [12, 0], sizes = [2, 128], strides = [1, 1]} : vector<16x128xf32> to vector<2x128xf32>
    %cst_29 = arith.constant dense<0.000000e+00> : vector<2x128xf32>
    %118 = tpu.matmul %116, %6, %cst_29 {dimension_numbers = #tpu.dot_dimension_numbers<[1], [0], [0], [1], [0, 0, 1, 1], [], []>} : vector<2x32xf32>, vector<32x128xf32>, vector<2x128xf32> -> vector<2x128xf32>
    %119 = arith.addf %117, %118 : vector<2x128xf32>
    %120 = math.tanh %119 : vector<2x128xf32>
    %121 = vector.extract_strided_slice %120 {offsets = [0, 0], sizes = [2, 96], strides = [1, 1]} : vector<2x128xf32> to vector<2x96xf32>
    %cst_30 = arith.constant 5.000000e-01 : f32
    %122 = vector.broadcast %cst_30 : f32 to vector<2x96xf32>
    %123 = arith.mulf %122, %121 : vector<2x96xf32>
    %cst_31 = arith.constant 5.000000e-01 : f32
    %124 = vector.broadcast %cst_31 : f32 to vector<2x96xf32>
    %125 = arith.addf %123, %124 : vector<2x96xf32>
    %126 = vector.extract_strided_slice %125 {offsets = [0, 0], sizes = [2, 32], strides = [1, 1]} : vector<2x96xf32> to vector<2x32xf32>
    %127 = vector.extract_strided_slice %125 {offsets = [0, 32], sizes = [2, 32], strides = [1, 1]} : vector<2x96xf32> to vector<2x32xf32>
    %128 = vector.extract_strided_slice %125 {offsets = [0, 64], sizes = [2, 32], strides = [1, 1]} : vector<2x96xf32> to vector<2x32xf32>
    %129 = vector.extract_strided_slice %120 {offsets = [0, 96], sizes = [2, 32], strides = [1, 1]} : vector<2x128xf32> to vector<2x32xf32>
    %130 = arith.mulf %127, %114 : vector<2x32xf32>
    %131 = arith.mulf %126, %129 : vector<2x32xf32>
    %132 = arith.addf %130, %131 : vector<2x32xf32>
    %133 = math.tanh %132 : vector<2x32xf32>
    %134 = arith.mulf %128, %133 : vector<2x32xf32>
    %135 = vector.extract_strided_slice %5 {offsets = [14, 0], sizes = [2, 128], strides = [1, 1]} : vector<16x128xf32> to vector<2x128xf32>
    %cst_32 = arith.constant dense<0.000000e+00> : vector<2x128xf32>
    %136 = tpu.matmul %134, %6, %cst_32 {dimension_numbers = #tpu.dot_dimension_numbers<[1], [0], [0], [1], [0, 0, 1, 1], [], []>} : vector<2x32xf32>, vector<32x128xf32>, vector<2x128xf32> -> vector<2x128xf32>
    %137 = arith.addf %135, %136 : vector<2x128xf32>
    %138 = math.tanh %137 : vector<2x128xf32>
    %139 = vector.extract_strided_slice %138 {offsets = [0, 0], sizes = [2, 96], strides = [1, 1]} : vector<2x128xf32> to vector<2x96xf32>
    %cst_33 = arith.constant 5.000000e-01 : f32
    %140 = vector.broadcast %cst_33 : f32 to vector<2x96xf32>
    %141 = arith.mulf %140, %139 : vector<2x96xf32>
    %cst_34 = arith.constant 5.000000e-01 : f32
    %142 = vector.broadcast %cst_34 : f32 to vector<2x96xf32>
    %143 = arith.addf %141, %142 : vector<2x96xf32>
    %144 = vector.extract_strided_slice %143 {offsets = [0, 0], sizes = [2, 32], strides = [1, 1]} : vector<2x96xf32> to vector<2x32xf32>
    %145 = vector.extract_strided_slice %143 {offsets = [0, 32], sizes = [2, 32], strides = [1, 1]} : vector<2x96xf32> to vector<2x32xf32>
    %146 = vector.extract_strided_slice %143 {offsets = [0, 64], sizes = [2, 32], strides = [1, 1]} : vector<2x96xf32> to vector<2x32xf32>
    %147 = vector.extract_strided_slice %138 {offsets = [0, 96], sizes = [2, 32], strides = [1, 1]} : vector<2x128xf32> to vector<2x32xf32>
    %148 = arith.mulf %145, %132 : vector<2x32xf32>
    %149 = arith.mulf %144, %147 : vector<2x32xf32>
    %150 = arith.addf %148, %149 : vector<2x32xf32>
    %151 = math.tanh %150 : vector<2x32xf32>
    %152 = arith.mulf %146, %151 : vector<2x32xf32>
    %153 = tpu.iota {dimensions = array<i32: 1>} : vector<2x32xi32>
    %c16_i32 = arith.constant 16 : i32
    %154 = vector.broadcast %c16_i32 : i32 to vector<2x32xi32>
    %155 = arith.cmpi slt, %153, %154 : vector<2x32xi32>
    %156 = arith.select %155, %26, %152 : vector<2x32xi1>, vector<2x32xf32>
    %157 = arith.select %155, %44, %134 : vector<2x32xi1>, vector<2x32xf32>
    %158 = arith.select %155, %62, %116 : vector<2x32xi1>, vector<2x32xf32>
    %159 = arith.select %155, %80, %98 : vector<2x32xi1>, vector<2x32xf32>
    %160 = arith.select %155, %98, %80 : vector<2x32xi1>, vector<2x32xf32>
    %161 = arith.select %155, %116, %62 : vector<2x32xi1>, vector<2x32xf32>
    %162 = arith.select %155, %134, %44 : vector<2x32xi1>, vector<2x32xf32>
    %163 = arith.select %155, %152, %26 : vector<2x32xi1>, vector<2x32xf32>
    %164 = tpu.concatenate %156, %157, %158, %159, %160, %161, %162, %163 in 0 : vector<2x32xf32>, vector<2x32xf32>, vector<2x32xf32>, vector<2x32xf32>, vector<2x32xf32>, vector<2x32xf32>, vector<2x32xf32>, vector<2x32xf32> -> vector<16x32xf32>
    %c0_35 = arith.constant 0 : index
    %c0_36 = arith.constant 0 : index
    %165 = vector.load %arg6[%c0_35, %c0_36] : memref<32x128xf32, #tpu.memory_space<vmem>>, vector<32x128xf32>
    %cst_37 = arith.constant dense<0.000000e+00> : vector<16x128xf32>
    %166 = tpu.matmul %164, %165, %cst_37 {dimension_numbers = #tpu.dot_dimension_numbers<[1], [0], [0], [1], [0, 0, 1, 1], [], []>} : vector<16x32xf32>, vector<32x128xf32>, vector<16x128xf32> -> vector<16x128xf32>
    %c0_38 = arith.constant 0 : index
    %c0_39 = arith.constant 0 : index
    %167 = vector.load %arg7[%c0_38, %c0_39] : memref<1x128xf32, #tpu.memory_space<vmem>>, vector<1x128xf32>
    %168 = vector.broadcast %167 : vector<1x128xf32> to vector<16x128xf32>
    %169 = arith.addf %166, %168 : vector<16x128xf32>
    %c0_40 = arith.constant 0 : index
    %c0_41 = arith.constant 0 : index
    %170 = vector.load %arg8[%c0_40, %c0_41] : memref<16x128xf32, #tpu.memory_space<vmem>>, vector<16x128xf32>
    tpu.vector_store %arg8[%c0_40, %c0_41], %169 {strides = array<i32>} : memref<16x128xf32, #tpu.memory_space<vmem>>, vector<16x128xf32>,
    return
  }
}

</mosaic_0001>

<bundles_post_ra>
// kernel: tpu_custom_call.1
= control target key start
LH: loop header
LB: loop body
LE: loop exit
PB: predicated region body
PF: predicated region fallthrough
CT: control target
= control target key end

     0   :  { %13 = vsyncpa [#allocation3], 0  ;;  %s1862_s0 = inlined_call_operand.hbm [shape: f32[16,32], index: 0, kind: input, shape index: {}]   ;;  %s1863_s1 = inlined_call_operand.hbm [shape: f32[32,128], index: 1, kind: input, shape index: {}]   ;;  %s1864_s2 = inlined_call_operand.vmem [shape: f32[1,128], index: 2, kind: input, shape index: {}]   ;;  %s1865_s3 = inlined_call_operand.hbm [shape: f32[32,128], index: 3, kind: input, shape index: {}]   ;;  %s1866_s4 = inlined_call_operand.vmem [shape: f32[2,32], index: 4, kind: input, shape index: {}]   ;;  %s1867_s5 = inlined_call_operand.vmem [shape: f32[2,32], index: 5, kind: input, shape index: {}]   ;;  %s1868_s6 = inlined_call_operand.hbm [shape: f32[32,128], index: 6, kind: input, shape index: {}]   ;;  %s1869_s7 = inlined_call_operand.vmem [shape: f32[1,128], index: 7, kind: input, shape index: {}]   ;;  %s1870_s8 = inlined_call_operand.hbm [shape: f32[16,128], index: 8, kind: output, shape index: {}]  }
   0x1   :  { %14 = vsyncpa [#allocation6], 0 }
   0x2   :  { %15 = vsyncpa [#allocation9], 0 }
   0x3   :  { %16 = vsyncpa [#allocation4], 0  ;;  %s1565_s27 = smov [#allocation5]   ;;  %s1566_s29 = smov [#allocation2]  }
   0x4   :  { %s34_s28 = sshll.u32 %s1565_s27, 4  ;;  %s22_s30 = sshll.u32 %s1566_s29, 4  ;;  %s35_s28 = int_to_ptr.vmem [resolvable:$true] %s34_s28  ;;  %s1622_s30 = int_to_ptr.vmem [resolvable:$true] %s22_s30 }
   0x5   :  { %s1447_s11 = scalar_lea.hbm %s1863_s1, 512 }
   0x6   :  { %p1448_p0 = scmp.ne.s32.totalorder %s1863_s1, %s1447_s11  ;;  %p1451_p1 = scmp.lt.u32.totalorder %s1447_s11, %s1863_s1 }
   0x8   :  { %p1453_p2 = pnand %p1451_p1, %p1448_p0 }
   0xa   :  { %1456 = shalt.err (!%p1453_p2)
}
   0xb   :  { %s1457_s16 = scalar_lea.vmem %s35_s28, 512  ;;  %p1462_p4 = scmp.lt.s32.totalorder %s35_s28, %s35_s28 }
   0xc   :  { %p1458_p3 = scmp.ne.s32.totalorder %s35_s28, %s1457_s16  ;;  %p1463_p5 = scmp.lt.s32.totalorder %s1457_s16, %s1457_s16 }
   0xe   :  { %p1464_p6 = por %p1463_p5, %p1462_p4 }
  0x10   :  { %p1465_p7 = pnand %p1464_p6, %p1458_p3 }
  0x12   :  { %1468 = shalt.err (!%p1465_p7)
}
  0x13   :  { %s1567_s17 = smov 128   ;;  %s1568_s18 = smov 8  }
  0x14   :  { %40 = dma.hbm_to_vmem [thread:$0]  %s1863_s1, 512, %s35_s28, [#allocation6], %s1567_s17, %s1567_s17, %s1568_s18  }
  0x15   :  { %s1469_s23 = scalar_lea.hbm %s1862_s0, 256 }
  0x16   :  { %p1470_p8 = scmp.ne.s32.totalorder %s1862_s0, %s1469_s23  ;;  %p1473_p9 = scmp.lt.u32.totalorder %s1469_s23, %s1862_s0 }
  0x18   :  { %p1475_p10 = pnand %p1473_p9, %p1470_p8 }
  0x1a   :  { %1478 = shalt.err (!%p1475_p10)
}
  0x1b   :  { %s1479_s29 = scalar_lea.vmem %s1622_s30, 256  ;;  %p1484_p12 = scmp.lt.s32.totalorder %s1622_s30, %s1622_s30 }
  0x1c   :  { %p1480_p11 = scmp.ne.s32.totalorder %s1622_s30, %s1479_s29  ;;  %p1485_p13 = scmp.lt.s32.totalorder %s1479_s29, %s1479_s29 }
  0x1e   :  { %p1486_p0 = por %p1485_p13, %p1484_p12 }
  0x20   :  { %p1487_p1 = pnand %p1486_p0, %p1480_p11 }
  0x22   :  { %1490 = shalt.err (!%p1487_p1)
}
  0x23   :  { %28 = dma.hbm_to_vmem [thread:$0]  %s1862_s0, 256, %s1622_s30, [#allocation3], %s1567_s17, %s1567_s17, %s1568_s18  }
  0x24   :  { %s1569_s9 = smov [#allocation7]   ;;  %s1570_s11 = smov [#allocation8]  }
  0x25   :  { %s48_s10 = sshll.u32 %s1569_s9, 4  ;;  %s64_s12 = sshll.u32 %s1570_s11, 4  ;;  %s49_s10 = int_to_ptr.vmem [resolvable:$true] %s48_s10  ;;  %s1659_s12 = int_to_ptr.vmem [resolvable:$true] %s64_s12 }
  0x26   :  { %s1491_s15 = scalar_lea.hbm %s1865_s3, 512 }
  0x27   :  { %p1492_p2 = scmp.ne.s32.totalorder %s1865_s3, %s1491_s15  ;;  %p1495_p3 = scmp.lt.u32.totalorder %s1491_s15, %s1865_s3 }
  0x29   :  { %p1497_p4 = pnand %p1495_p3, %p1492_p2 }
  0x2b   :  { %1500 = shalt.err (!%p1497_p4)
}
  0x2c   :  { %s1501_s0 = scalar_lea.vmem %s49_s10, 512  ;;  %p1506_p6 = scmp.lt.s32.totalorder %s49_s10, %s49_s10 }
  0x2d   :  { %p1502_p5 = scmp.ne.s32.totalorder %s49_s10, %s1501_s0  ;;  %p1507_p7 = scmp.lt.s32.totalorder %s1501_s0, %s1501_s0 }
  0x2f   :  { %p1508_p8 = por %p1507_p7, %p1506_p6 }
  0x31   :  { %p1509_p9 = pnand %p1508_p8, %p1502_p5 }
  0x33   :  { %1512 = shalt.err (!%p1509_p9)
}
  0x34   :  { %54 = dma.hbm_to_vmem [thread:$0]  %s1865_s3, 512, %s49_s10, [#allocation6], %s1567_s17, %s1567_s17, %s1568_s18  }
  0x35   :  { %s1513_s25 = scalar_lea.hbm %s1868_s6, 512 }
  0x36   :  { %p1514_p10 = scmp.ne.s32.totalorder %s1868_s6, %s1513_s25  ;;  %p1517_p11 = scmp.lt.u32.totalorder %s1513_s25, %s1868_s6 }
  0x38   :  { %p1519_p12 = pnand %p1517_p11, %p1514_p10 }
  0x3a   :  { %1522 = shalt.err (!%p1519_p12)
}
  0x3b   :  { %s1523_s28 = scalar_lea.vmem %s1659_s12, 512  ;;  %p1528_p0 = scmp.lt.s32.totalorder %s1659_s12, %s1659_s12 }
  0x3c   :  { %p1524_p13 = scmp.ne.s32.totalorder %s1659_s12, %s1523_s28  ;;  %p1529_p1 = scmp.lt.s32.totalorder %s1523_s28, %s1523_s28 }
  0x3e   :  { %p1530_p2 = por %p1529_p1, %p1528_p0 }
  0x40   :  { %p1531_p3 = pnand %p1530_p2, %p1524_p13 }
  0x42   :  { %1534 = shalt.err (!%p1531_p3)
}
  0x43   :  { %70 = dma.hbm_to_vmem [thread:$0]  %s1868_s6, 512, %s1659_s12, [#allocation9], %s1567_s17, %s1567_s17, %s1568_s18  }
  0x44   :  { %1557 = dma.done.wait [#allocation3], 256  }
  0x45   :  { %1558 = vsyncadd [#allocation3], 4294967040 }
  0x46   :  { %1559 = dma.done.wait [#allocation6], 1024  }
  0x47   :  { %1560 = vsyncadd [#allocation6], 4294966272 }
  0x48   :  { %1561 = dma.done.wait [#allocation9], 512  }
  0x49   :  { %1562 = vsyncadd [#allocation9], 4294966784  ;;  %v1571_v0 = vmov 0.0|0.0   ;;  %vm1572_vm0 = vmmov 0   ;;  %v1573_v1 = vmov 0.0   ;;  %v87_v2 = vld [vmem:[#allocation5] sm:$0xff] }
  0x4a   :  { %1347 = vmatprep.subr.bf16.mxu1 %v1571_v0  ;;  %1248 = vmatprep.mubr.msk.f32.mxu1 %vm1572_vm0, %v1573_v1  ;;  %v88_v3 = vld [vmem:[#allocation5 + $0x8] sm:$0xff]  ;;  %v180_v4 = vld [vmem:[#allocation7] sm:$0xff]  ;;  %vm98_vm1 = vcmask 261120   ;;  %v89_v7 = vld [vmem:[#allocation5 + $0x10] sm:$0xff]  ;;  %s1574_s12 = smov 32   ;;  %vm1041_vm3 = vcmask 1041408  }
  0x4b   :  { %v1339_v5 = vpack.c.bf16 %v88_v3, %v87_v2  ;;  %v181_v6 = vld [vmem:[#allocation7 + $0x8] sm:$0xff]  ;;  %v90_v8 = vld [vmem:[#allocation5 + $0x18] sm:$0xff]  ;;  %v85_v11 = vld [vmem:[#allocation2] sm:$0xff]  ;;  %vm1043_vm4 = vcmask 1043456   ;;  %vm1045_vm5 = vcmask 1045504   ;;  %s1576_s16 = smov [#allocation10]  }
  0x4c   :  { %v1699_v9 = vpack.c.bf16 %v181_v6, %v180_v4  ;;  %v1343_v10 = vpack.c.bf16 %v90_v8, %v89_v7  ;;  %v182_v12 = vld [vmem:[#allocation7 + $0x10] sm:$0xff]  ;;  %v183_v13 = vld [vmem:[#allocation7 + $0x18] sm:$0xff]  ;;  %1237 = vmatprep.mubr.msk.f32.mxu0 %vm98_vm1, %v85_v11  ;;  %s1149_s19 = sshll.u32 %s1576_s16, 4  ;;  %s1150_s19 = int_to_ptr.vmem [resolvable:$true] %s1149_s19 }
  0x4d   :  { %1340 = vmatprep.subr.bf16.mxu0 %v1339_v5  ;;  %v1703_v14 = vpack.c.bf16 %v183_v13, %v182_v12  ;;  %v86_v15 = vld [vmem:[#allocation2 + $0x8] sm:$0xff]  ;;  %v184_v16 = vld [vmem:[%s1866_s4] sm:$0x3]  ;;  %s1535_s20 = scalar_lea.vmem %s1150_s19, 256  ;;  %p1540_p5 = scmp.lt.s32.totalorder %s1150_s19, %s1150_s19 }
  0x4e   :  { %1342 = vmatpush3.bf16.msra.mxu0 %v1339_v5  ;;  %1349 = vmatpush3.bf16.msra.mxu1 %v1699_v9  ;;  %v1163_v17 = vld [vmem:[%s1864_s2] ss:$0 sm:$0xff]  ;;  %s1575_s2 = smov 64   ;;  %p1536_p4 = scmp.ne.s32.totalorder %s1150_s19, %s1535_s20 }
  0x4f   :  { %1344 = vmatprep.subr.bf16.mxu0 %v1343_v10  ;;  %1350 = vmatprep.subr.bf16.mxu1 %v1571_v0  ;;  %v185_v26 = vld [vmem:[%s1867_s5] sm:$0x3]  ;;  %p1541_p6 = scmp.lt.s32.totalorder %s1535_s20, %s1535_s20 }
  0x51   :  { %p1542_p7 = por %p1541_p6, %p1540_p5 }
  0x52   :  { %1346 = vmatpush3.bf16.msra.mxu0 %v1343_v10  ;;  %1352 = vmatpush3.bf16.msra.mxu1 %v1703_v14 }
  0x53   :  { %1353 = vmatprep.subr.bf16.mxu0 %v1571_v0  ;;  %1359 = vmatprep.subr.bf16.mxu1 %v1571_v0  ;;  %p1543_p8 = pnand %p1542_p7, %p1536_p4 }
  0x55   :  { %1238 = vmatmul.mubr.msk.f32.vlgmr.msra.gmra.mrb[0].mxu0 %vm98_vm1, %v86_v15  ;;  %1249 = vmatmul.mubr.msk.f32.vlgmr.msra.gmra.mrb[0].mxu1 %vm98_vm1, %v184_v16 }
  0x56   :  { %1355 = vmatpush3.bf16.msra.mxu0 %v1699_v9  ;;  %1259 = vmatprep.mubr.msk.f32.mxu0 %vm1572_vm0, %v1573_v1 }
  0x57   :  { %1356 = vmatprep.subr.bf16.mxu0 %v1571_v0  ;;  %1361 = vmatpush3.bf16.msra.mxu1 %v1699_v9 }
  0x58   :  { %1362 = vmatprep.subr.bf16.mxu1 %v1571_v0  ;;  %1270 = vmatprep.mubr.msk.f32.mxu1 %vm1572_vm0, %v1573_v1 }
  0x5a   :  { %1358 = vmatpush3.bf16.msra.mxu0 %v1703_v14 }
  0x5b   :  { %1364 = vmatpush3.bf16.msra.mxu1 %v1703_v14  ;;  %1365 = vmatprep.subr.bf16.mxu0 %v1571_v0 }
  0x5c   :  { %1371 = vmatprep.subr.bf16.mxu1 %v1571_v0 }
 0x128   :  { %v1239_v18 = vpop.f32.mrb[0].mxu0  ;;  %v255_v19 = vpop.f32.mrb[0].mxu1 }
 0x129   :  { %v1729_v20 = vadd.f32 %v1239_v18, %v1163_v17  ;;  %v171_v21 = vpop.f32.mrb[1].mxu0  ;;  %v1250_v22 = vpop.f32.mrb[1].mxu1 }
 0x12a   :  { %v1731_v23 = vadd.f32 %v1163_v17, %v171_v21 }
 0x12c   :  { %v259_v24 = vadd.f32 %v255_v19, %v1731_v23 }
 0x12e   :  { %1415 = vtanh.f32 %v259_v24 }
 0x138   :  { %v1416_v25 = vpop.eup %1415 }
 0x139   :  { %269 = vrot.lane.b32.xlu0 %v1416_v25, %s1574_s12  ;;  %v261_v27 = vmul.f32 0.5, %v1416_v25 }
 0x13b   :  { %v262_v28 = vadd.f32 0.5, %v261_v27 }
 0x13d   :  { %264 = vrot.lane.b32.xlu0 %v185_v26, %s1574_s12 }
 0x1ab   :  { %v270_v29 = vpop.permute.xlu0 %269 }
 0x1ac   :  { %v272_v30 = vmul.f32 %v270_v29, %v262_v28 }
 0x1ae   :  { %274 = vrot.lane.b32.xlu1 %v272_v30, %s1574_s12 }
 0x1af   :  { %v265_v31 = vpop.permute.xlu0 %264 }
 0x1b0   :  { %v267_v32 = vmul.f32 %v265_v31, %v262_v28 }
 0x220   :  { %v275_v33 = vpop.permute.xlu1 %274 }
 0x221   :  { %v277_v34 = vadd.f32 %v275_v33, %v267_v32 }
 0x223   :  { %1417 = vtanh.f32 %v277_v34  ;;  %v367_v48 = vrot.slane %v277_v34, 6 }
 0x22d   :  { %v1418_v35 = vpop.eup %1417 }
 0x22e   :  { %280 = vrot.lane.b32.xlu1 %v1418_v35, %s1574_s12 }
 0x2a0   :  { %v281_v36 = vpop.permute.xlu1 %280 }
 0x2a1   :  { %v283_v37 = vmul.f32 %v281_v36, %v262_v28 }
 0x2a3   :  { %285 = vrot.lane.b32.xlu0 %v283_v37, %s1575_s2 }
 0x315   :  { %v1742_v38 = vpop.permute.xlu0 %285 }
 0x316   :  { %1260 = vmatmul.mubr.msk.f32.vlgmr.msra.gmra.mrb[2].mxu0 %vm98_vm1, %v1742_v38 }
 0x317   :  { %1367 = vmatpush3.bf16.msra.mxu0 %v1699_v9  ;;  %1281 = vmatprep.mubr.msk.f32.mxu0 %vm1572_vm0, %v1573_v1 }
 0x318   :  { %1368 = vmatprep.subr.bf16.mxu0 %v1571_v0 }
 0x31b   :  { %1370 = vmatpush3.bf16.msra.mxu0 %v1703_v14 }
 0x31c   :  { %1377 = vmatprep.subr.bf16.mxu0 %v1571_v0 }
 0x3e9   :  { %v355_v39 = vpop.f32.mrb[2].mxu0 }
 0x3ea   :  { %v360_v40 = vrot.slane %v355_v39, 6  ;;  %v1261_v41 = vpop.f32.mrb[3].mxu0 }
 0x3ec   :  { %v362_v42 = vadd.f32 %v360_v40, %v1731_v23 }
 0x3ee   :  { %1419 = vtanh.f32 %v362_v42 }
 0x3f8   :  { %v1420_v43 = vpop.eup %1419 }
 0x3f9   :  { %371 = vrot.lane.b32.xlu1 %v1420_v43, %s1574_s12  ;;  %v364_v44 = vmul.f32 0.5, %v1420_v43 }
 0x3fb   :  { %v365_v45 = vadd.f32 0.5, %v364_v44 }
 0x3fd   :  { %v369_v49 = vmul.f32 %v367_v48, %v365_v45 }
 0x46b   :  { %v372_v46 = vpop.permute.xlu1 %371 }
 0x46c   :  { %v374_v47 = vmul.f32 %v372_v46, %v365_v45 }
 0x46e   :  { %376 = vrot.lane.b32.xlu0 %v374_v47, %s1574_s12 }
 0x4e0   :  { %v377_v50 = vpop.permute.xlu0 %376 }
 0x4e1   :  { %v379_v51 = vadd.f32 %v377_v50, %v369_v49 }
 0x4e3   :  { %1421 = vtanh.f32 %v379_v51  ;;  %v470_v4 = vrot.slane %v379_v51, 6 }
 0x4ed   :  { %v1422_v52 = vpop.eup %1421 }
 0x4ee   :  { %382 = vrot.lane.b32.xlu1 %v1422_v52, %s1574_s12 }
 0x560   :  { %v383_v53 = vpop.permute.xlu1 %382 }
 0x561   :  { %v385_v54 = vmul.f32 %v383_v53, %v365_v45 }
 0x563   :  { %v387_v55 = vrot.slane %v385_v54, 2 }
 0x565   :  { %388 = vrot.lane.b32.xlu0 %v387_v55, %s1575_s2 }
 0x5d7   :  { %v1757_v56 = vpop.permute.xlu0 %388 }
 0x5d8   :  { %1271 = vmatmul.mubr.msk.f32.vlgmr.msra.gmra.mrb[2].mxu1 %vm98_vm1, %v1757_v56 }
 0x5d9   :  { %1373 = vmatpush3.bf16.msra.mxu1 %v1699_v9  ;;  %1292 = vmatprep.mubr.msk.f32.mxu1 %vm1572_vm0, %v1573_v1 }
 0x5da   :  { %1374 = vmatprep.subr.bf16.mxu1 %v1571_v0 }
 0x5dd   :  { %1376 = vmatpush3.bf16.msra.mxu1 %v1703_v14 }
 0x5de   :  { %1383 = vmatprep.subr.bf16.mxu1 %v1571_v0 }
 0x6ab   :  { %v458_v57 = vpop.f32.mrb[2].mxu1 }
 0x6ac   :  { %v463_v58 = vrot.slane %v458_v57, 4  ;;  %v1272_v59 = vpop.f32.mrb[3].mxu1 }
 0x6ae   :  { %v465_v60 = vadd.f32 %v463_v58, %v1731_v23 }
 0x6b0   :  { %1423 = vtanh.f32 %v465_v60 }
 0x6ba   :  { %v1424_v61 = vpop.eup %1423 }
 0x6bb   :  { %474 = vrot.lane.b32.xlu1 %v1424_v61, %s1574_s12  ;;  %v467_v62 = vmul.f32 0.5, %v1424_v61 }
 0x6bd   :  { %v468_v63 = vadd.f32 0.5, %v467_v62 }
 0x6bf   :  { %v472_v5 = vmul.f32 %v470_v4, %v468_v63 }
 0x72d   :  { %v475_v2 = vpop.permute.xlu1 %474 }
 0x72e   :  { %v477_v3 = vmul.f32 %v475_v2, %v468_v63 }
 0x730   :  { %479 = vrot.lane.b32.xlu0 %v477_v3, %s1574_s12 }
 0x7a2   :  { %v480_v6 = vpop.permute.xlu0 %479 }
 0x7a3   :  { %v482_v7 = vadd.f32 %v480_v6, %v472_v5 }
 0x7a5   :  { %1425 = vtanh.f32 %v482_v7  ;;  %v573_v26 = vrot.slane %v482_v7, 6 }
 0x7af   :  { %v1426_v8 = vpop.eup %1425 }
 0x7b0   :  { %485 = vrot.lane.b32.xlu1 %v1426_v8, %s1574_s12 }
 0x822   :  { %v486_v10 = vpop.permute.xlu1 %485 }
 0x823   :  { %v488_v11 = vmul.f32 %v486_v10, %v468_v63 }
 0x825   :  { %v490_v12 = vrot.slane %v488_v11, 4 }
 0x827   :  { %491 = vrot.lane.b32.xlu0 %v490_v12, %s1575_s2 }
 0x899   :  { %v1772_v13 = vpop.permute.xlu0 %491 }
 0x89a   :  { %1282 = vmatmul.mubr.msk.f32.vlgmr.msra.gmra.mrb[4].mxu0 %vm98_vm1, %v1772_v13 }
 0x89b   :  { %1379 = vmatpush3.bf16.msra.mxu0 %v1699_v9  ;;  %1303 = vmatprep.mubr.msk.f32.mxu0 %vm1572_vm0, %v1573_v1 }
 0x89c   :  { %1380 = vmatprep.subr.bf16.mxu0 %v1571_v0 }
 0x89f   :  { %1382 = vmatpush3.bf16.msra.mxu0 %v1703_v14 }
 0x8a0   :  { %1389 = vmatprep.subr.bf16.mxu0 %v1571_v0 }
 0x96d   :  { %v561_v15 = vpop.f32.mrb[4].mxu0 }
 0x96e   :  { %v566_v16 = vrot.slane %v561_v15, 2  ;;  %v1283_v17 = vpop.f32.mrb[5].mxu0 }
 0x970   :  { %v568_v18 = vadd.f32 %v566_v16, %v1731_v23 }
 0x972   :  { %1427 = vtanh.f32 %v568_v18 }
 0x97c   :  { %v1428_v19 = vpop.eup %1427 }
 0x97d   :  { %577 = vrot.lane.b32.xlu1 %v1428_v19, %s1574_s12  ;;  %v570_v21 = vmul.f32 0.5, %v1428_v19 }
 0x97f   :  { %v571_v22 = vadd.f32 0.5, %v570_v21 }
 0x981   :  { %v575_v27 = vmul.f32 %v573_v26, %v571_v22 }
 0x9ef   :  { %v578_v24 = vpop.permute.xlu1 %577 }
 0x9f0   :  { %v580_v25 = vmul.f32 %v578_v24, %v571_v22 }
 0x9f2   :  { %582 = vrot.lane.b32.xlu0 %v580_v25, %s1574_s12 }
 0xa64   :  { %v583_v28 = vpop.permute.xlu0 %582 }
 0xa65   :  { %v585_v29 = vadd.f32 %v583_v28, %v575_v27 }
 0xa67   :  { %1429 = vtanh.f32 %v585_v29  ;;  %v673_v43 = vrot.slane %v585_v29, 6 }
 0xa71   :  { %v1430_v30 = vpop.eup %1429 }
 0xa72   :  { %588 = vrot.lane.b32.xlu1 %v1430_v30, %s1574_s12 }
 0xae4   :  { %v589_v31 = vpop.permute.xlu1 %588 }
 0xae5   :  { %v591_v23 = vmul.f32 %v589_v31, %v571_v22 }
 0xae7   :  { %v593_v32 = vrot.slane %v591_v23, 6 }
 0xae9   :  { %594 = vrot.lane.b32.xlu0 %v593_v32, %s1575_s2 }
 0xb5b   :  { %v1787_v33 = vpop.permute.xlu0 %594 }
 0xb5c   :  { %1293 = vmatmul.mubr.msk.f32.vlgmr.msra.gmra.mrb[4].mxu1 %vm98_vm1, %v1787_v33 }
 0xb5d   :  { %1385 = vmatpush3.bf16.msra.mxu1 %v1699_v9  ;;  %1314 = vmatprep.mubr.msk.f32.mxu1 %vm1572_vm0, %v1573_v1 }
 0xb5e   :  { %1386 = vmatprep.subr.bf16.mxu1 %v1571_v0 }
 0xb61   :  { %1388 = vmatpush3.bf16.msra.mxu1 %v1703_v14 }
 0xc2f   :  { %v664_v34 = vpop.f32.mrb[4].mxu1 }
 0xc30   :  { %v668_v35 = vadd.f32 %v664_v34, %v1729_v20  ;;  %v1294_v36 = vpop.f32.mrb[5].mxu1 }
 0xc32   :  { %1431 = vtanh.f32 %v668_v35 }
 0xc3c   :  { %v1432_v37 = vpop.eup %1431 }
 0xc3d   :  { %677 = vrot.lane.b32.xlu1 %v1432_v37, %s1574_s12  ;;  %v670_v39 = vmul.f32 0.5, %v1432_v37 }
 0xc3f   :  { %v671_v40 = vadd.f32 0.5, %v670_v39 }
 0xc41   :  { %v675_v44 = vmul.f32 %v673_v43, %v671_v40 }
 0xcaf   :  { %v678_v41 = vpop.permute.xlu1 %677 }
 0xcb0   :  { %v680_v42 = vmul.f32 %v678_v41, %v671_v40  ;;  %v1050_v41 = vld [vmem:[#allocation8] sm:$0xff] }
 0xcb2   :  { %682 = vrot.lane.b32.xlu0 %v680_v42, %s1574_s12  ;;  %v1051_v42 = vld [vmem:[#allocation8 + $0x8] sm:$0xff] }
 0xcb3   :  { %v1395_v43 = vpack.c.bf16 %v1051_v42, %v1050_v41 }
 0xcb5   :  { %1396 = vmatprep.subr.bf16.mxu1 %v1395_v43 }
 0xd24   :  { %v683_v45 = vpop.permute.xlu0 %682 }
 0xd25   :  { %v685_v46 = vadd.f32 %v683_v45, %v675_v44  ;;  %v1052_v44 = vld [vmem:[#allocation8 + $0x10] sm:$0xff]  ;;  %v1053_v45 = vld [vmem:[#allocation8 + $0x18] sm:$0xff] }
 0xd27   :  { %1433 = vtanh.f32 %v685_v46 }
 0xd31   :  { %v1434_v47 = vpop.eup %1433 }
 0xd32   :  { %688 = vrot.lane.b32.xlu1 %v1434_v47, %s1574_s12 }
 0xda4   :  { %v689_v48 = vpop.permute.xlu1 %688 }
 0xda5   :  { %v691_v49 = vmul.f32 %v689_v48, %v671_v40 }
 0xda7   :  { %693 = vrot.lane.b32.xlu0 %v691_v49, %s1575_s2 }
 0xe19   :  { %v1801_v50 = vpop.permute.xlu0 %693 }
 0xe1a   :  { %1304 = vmatmul.mubr.msk.f32.vlgmr.msra.gmra.mrb[6].mxu0 %vm98_vm1, %v1801_v50 }
 0xe1b   :  { %1391 = vmatpush3.bf16.msra.mxu0 %v1699_v9  ;;  %1325 = vmatprep.mubr.msk.f32.mxu0 %vm1572_vm0, %v1573_v1  ;;  %v775_v1 = vrot.slane %v685_v46, 6  ;;  %v1399_v46 = vpack.c.bf16 %v1053_v45, %v1052_v44 }
 0xe1c   :  { %1392 = vmatprep.subr.bf16.mxu0 %v1571_v0 }
 0xe1f   :  { %1394 = vmatpush3.bf16.msra.mxu0 %v1703_v14 }
 0xeed   :  { %v763_v51 = vpop.f32.mrb[6].mxu0 }
 0xeee   :  { %v768_v52 = vrot.slane %v763_v51, 6  ;;  %v1305_v53 = vpop.f32.mrb[7].mxu0  ;;  %v1000_v51 = vlaneseq }
 0xef0   :  { %v770_v54 = vadd.f32 %v768_v52, %v1729_v20  ;;  %v1001_v52 = vand.u32 127, %v1000_v51 }
 0xef2   :  { %1435 = vtanh.f32 %v770_v54  ;;  %vm1002_vm2 = vcmp.lt.s32.totalorder %v1001_v52, 16 }
 0xefc   :  { %v1436_v55 = vpop.eup %1435 }
 0xefd   :  { %779 = vrot.lane.b32.xlu1 %v1436_v55, %s1574_s12  ;;  %v772_v57 = vmul.f32 0.5, %v1436_v55 }
 0xeff   :  { %v773_v58 = vadd.f32 0.5, %v772_v57 }
 0xf01   :  { %v777_v60 = vmul.f32 %v775_v1, %v773_v58  ;;  %v1019_v1 = vsel %vm1002_vm2, %v1801_v50, %v1787_v33 }
 0xf6f   :  { %v780_v59 = vpop.permute.xlu1 %779 }
 0xf70   :  { %v782_v9 = vmul.f32 %v780_v59, %v773_v58  ;;  %v1018_v59 = vsel %vm1002_vm2, %v1787_v33, %v1801_v50  ;;  %v1174_v33 = vld [vmem:[%s1869_s7] ss:$0 sm:$0xff] }
 0xf72   :  { %784 = vrot.lane.b32.xlu0 %v782_v9, %s1574_s12 }
 0xfe4   :  { %v785_v0 = vpop.permute.xlu0 %784 }
 0xfe5   :  { %v787_v61 = vadd.f32 %v785_v0, %v777_v60 }
 0xfe7   :  { %1437 = vtanh.f32 %v787_v61  ;;  %v878_v16 = vrot.slane %v787_v61, 6 }
 0xff1   :  { %v1438_v14 = vpop.eup %1437 }
 0xff2   :  { %790 = vrot.lane.b32.xlu1 %v1438_v14, %s1574_s12 }
0x1064   :  { %v791_v62 = vpop.permute.xlu1 %790 }
0x1065   :  { %v793_v63 = vmul.f32 %v791_v62, %v773_v58  ;;  %v1030_v62 = vrot.slane %v1018_v59, 2 }
0x1067   :  { %v795_v2 = vrot.slane %v793_v63, 2 }
0x1069   :  { %796 = vrot.lane.b32.xlu0 %v795_v2, %s1575_s2 }
0x10db   :  { %v1815_v3 = vpop.permute.xlu0 %796 }
0x10dc   :  { %1315 = vmatmul.mubr.msk.f32.vlgmr.msra.gmra.mrb[6].mxu1 %vm98_vm1, %v1815_v3  ;;  %v1020_v53 = vsel %vm1002_vm2, %v1815_v3, %v1772_v13  ;;  %v1015_v57 = vsel %vm1002_vm2, %v1772_v13, %v1815_v3 }
0x10dd   :  { %1398 = vmatpush3.bf16.msra.mxu1 %v1395_v43  ;;  %v1033_v58 = vrot.slane %v1020_v53, 6  ;;  %v1027_v61 = vrot.slane %v1015_v57, 4 }
0x10de   :  { %1400 = vmatprep.subr.bf16.mxu1 %v1399_v46 }
0x10df   :  { %v1047_v13 = vsel %vm1041_vm3, %v1019_v1, %v1033_v58 }
0x10e1   :  { %1402 = vmatpush3.bf16.msra.mxu1 %v1399_v46 }
0x11af   :  { %v866_v4 = vpop.f32.mrb[6].mxu1 }
0x11b0   :  { %v871_v5 = vrot.slane %v866_v4, 4  ;;  %v1316_v6 = vpop.f32.mrb[7].mxu1 }
0x11b2   :  { %v873_v7 = vadd.f32 %v871_v5, %v1729_v20 }
0x11b4   :  { %1439 = vtanh.f32 %v873_v7 }
0x11be   :  { %v1440_v8 = vpop.eup %1439 }
0x11bf   :  { %882 = vrot.lane.b32.xlu1 %v1440_v8, %s1574_s12  ;;  %v875_v10 = vmul.f32 0.5, %v1440_v8 }
0x11c1   :  { %v876_v11 = vadd.f32 0.5, %v875_v10 }
0x11c3   :  { %v880_v17 = vmul.f32 %v878_v16, %v876_v11 }
0x1231   :  { %v883_v12 = vpop.permute.xlu1 %882 }
0x1232   :  { %v885_v15 = vmul.f32 %v883_v12, %v876_v11 }
0x1234   :  { %887 = vrot.lane.b32.xlu0 %v885_v15, %s1574_s12 }
0x12a6   :  { %v888_v18 = vpop.permute.xlu0 %887 }
0x12a7   :  { %v890_v19 = vadd.f32 %v888_v18, %v880_v17 }
0x12a9   :  { %1441 = vtanh.f32 %v890_v19  ;;  %v981_v36 = vrot.slane %v890_v19, 6 }
0x12b3   :  { %v1442_v21 = vpop.eup %1441 }
0x12b4   :  { %893 = vrot.lane.b32.xlu1 %v1442_v21, %s1574_s12 }
0x1326   :  { %v894_v22 = vpop.permute.xlu1 %893 }
0x1327   :  { %v896_v24 = vmul.f32 %v894_v22, %v876_v11 }
0x1329   :  { %v898_v25 = vrot.slane %v896_v24, 4 }
0x132b   :  { %899 = vrot.lane.b32.xlu0 %v898_v25, %s1575_s2 }
0x139d   :  { %v900_v26 = vpop.permute.xlu0 %899 }
0x139e   :  { %1326 = vmatmul.mubr.msk.f32.vlgmr.msra.gmra.mrb[8].mxu0 %vm98_vm1, %v900_v26  ;;  %v1021_v54 = vsel %vm1002_vm2, %v900_v26, %v1757_v56  ;;  %v1012_v55 = vsel %vm1002_vm2, %v1757_v56, %v900_v26 }
0x139f   :  { %v1036_v9 = vrot.slane %v1021_v54, 4  ;;  %v1024_v60 = vrot.slane %v1012_v55, 6 }
0x13a1   :  { %v1048_v4 = vsel %vm1043_vm4, %v1047_v13, %v1036_v9 }
0x1471   :  { %v969_v27 = vpop.f32.mrb[8].mxu0 }
0x1472   :  { %v974_v28 = vrot.slane %v969_v27, 2  ;;  %v1327_v29 = vpop.f32.mrb[9].mxu0 }
0x1474   :  { %v976_v30 = vadd.f32 %v974_v28, %v1729_v20 }
0x1476   :  { %1443 = vtanh.f32 %v976_v30 }
0x1480   :  { %v1444_v31 = vpop.eup %1443 }
0x1481   :  { %985 = vrot.lane.b32.xlu1 %v1444_v31, %s1574_s12  ;;  %v978_v23 = vmul.f32 0.5, %v1444_v31 }
0x1483   :  { %v979_v32 = vadd.f32 0.5, %v978_v23 }
0x1485   :  { %v983_v37 = vmul.f32 %v981_v36, %v979_v32 }
0x14f3   :  { %v986_v34 = vpop.permute.xlu1 %985 }
0x14f4   :  { %v988_v35 = vmul.f32 %v986_v34, %v979_v32 }
0x14f6   :  { %990 = vrot.lane.b32.xlu0 %v988_v35, %s1574_s12 }
0x1568   :  { %v991_v39 = vpop.permute.xlu0 %990 }
0x1569   :  { %v993_v40 = vadd.f32 %v991_v39, %v983_v37 }
0x156b   :  { %1445 = vtanh.f32 %v993_v40 }
0x1575   :  { %v1446_v20 = vpop.eup %1445 }
0x1576   :  { %996 = vrot.lane.b32.xlu1 %v1446_v20, %s1574_s12 }
0x15e8   :  { %v997_v47 = vpop.permute.xlu1 %996 }
0x15e9   :  { %v999_v48 = vmul.f32 %v997_v47, %v979_v32 }
0x15eb   :  { %v1005_v49 = vrot.slane %v999_v48, 6 }
0x15ed   :  { %1006 = vrot.lane.b32.xlu0 %v1005_v49, %s1575_s2 }
0x165f   :  { %v1007_v0 = vpop.permute.xlu0 %1006 }
0x1660   :  { %v1009_v14 = vsel %vm1002_vm2, %v1742_v38, %v1007_v0  ;;  %v1022_v56 = vsel %vm1002_vm2, %v1007_v0, %v1742_v38 }
0x1661   :  { %v1039_v63 = vrot.slane %v1022_v56, 2  ;;  %v1042_v2 = vsel %vm1041_vm3, %v1009_v14, %v1024_v60 }
0x1662   :  { %v1044_v3 = vsel %vm1043_vm4, %v1042_v2, %v1027_v61 }
0x1663   :  { %v1046_v5 = vsel %vm1045_vm5, %v1044_v3, %v1030_v62  ;;  %v1049_v6 = vsel %vm1045_vm5, %v1048_v4, %v1039_v63 }
0x1664   :  { %1336 = vmatprep.mubr.msk.f32.mxu1 %vm98_vm1, %v1046_v5 }
0x1665   :  { %1337 = vmatmul.mubr.msk.f32.vlgmr.msra.gmra.mrb[8].mxu1 %vm98_vm1, %v1049_v6 }
0x1738   :  { %v1338_v38 = vpop.f32.mrb[8].mxu1 }
0x1739   :  { %v1139_v50 = vadd.f32 %v1338_v38, %v1174_v33  ;;  %v1133_v7 = vpop.f32.mrb[9].mxu1 }
0x173a   :  { %v1134_v8 = vadd.f32 %v1174_v33, %v1133_v7 }
0x173b   :  { %1143 = vst [vmem:[#allocation10 + $0x8] sm:$0xff] %v1139_v50 }
0x173c   :  { %1142 = vst [vmem:[#allocation10] sm:$0xff] %v1134_v8 }
0x173d   :  { %1546 = shalt.err (!%p1543_p8)
}
0x173e   :  { %s1547_s7 = scalar_lea.hbm %s1870_s8, 256 }
0x173f   :  { %p1548_p9 = scmp.ne.s32.totalorder %s1870_s8, %s1547_s7  ;;  %p1551_p10 = scmp.lt.u32.totalorder %s1547_s7, %s1870_s8 }
0x1741   :  { %p1553_p11 = pnand %p1551_p10, %p1548_p9 }
0x1743   :  { %1556 = shalt.err (!%p1553_p11)
}
0x1744   :  { %1155 = dma.vmem_to_hbm [thread:$0]  %s1150_s19, 256, %s1870_s8, [#allocation4], %s1567_s17, %s1567_s17, %s1568_s18  }
0x1745   :  { %1563 = dma.done.wait [#allocation4], 256  }
0x1746   :  { %1564 = vsyncadd [#allocation4], 4294967040 }
0x1747   :  { %1159 = vsyncpa [#allocation3], 1 }
0x1748   :  { %1160 = vsyncpa [#allocation6], 1 }
0x1749   :  { %1161 = vsyncpa [#allocation9], 1 }
0x174a   :  { %1162 = vsyncpa [#allocation4], 1 }

</bundles_post_ra>
